<compile_context>
chip_gen: v7x
topology: tpu7x:2x2x1
jax: 0.10.0
libtpu: 0.0.40
codegen_flags: <defaults>
</compile_context>

<pallas_src>
import jax
import jax.numpy as jnp
from jax.experimental import pallas as pl
from jax.experimental.pallas import tpu as pltpu

IN_FEATURES = 10
OUT_FEATURES = 5

SMALL_B = 1024      # below this: single no-grid pallas_call, everything in VMEM
TM_MAX = 4096       # max batch tile for the large-batch (tiled) path


def _linear_kernel(x_ref, w_ref, b_ref, o_ref):
    # x_ref: (tm, 10); w_ref: (10, 5); b_ref: (1, 5); o_ref: (tm, 5)
    acc = jnp.dot(x_ref[...], w_ref[...], preferred_element_type=jnp.float32)
    o_ref[...] = (acc + b_ref[...]).astype(o_ref.dtype)  # bias add rides VPU


def prepare_params(weight, bias):
    """One-time parameter prep (NOT in the forward hot path).

    weight: (5, 10) f32, PyTorch nn.Linear layout.  bias: (5,) f32.
    Returns w_t (10, 5) = weight.T and b_row (1, 5).
    """
    return jnp.asarray(weight).T, jnp.asarray(bias).reshape(1, OUT_FEATURES)


def _pick_tm(B):
    """Largest 8-aligned batch tile <= TM_MAX that still leaves >= 2 grid
    steps, so the 'parallel' axis can be split across two TensorCores (v7x)
    while amortizing the ~0.35 us/step grid overhead."""
    tm = min(TM_MAX, pl.cdiv(B, 2))
    tm = max(8, (tm // 8) * 8)
    return tm


def dummy_model_forward(x, w_t, b_row):
    """x: (B, 10) f32; w_t/b_row from prepare_params().  Returns (B, 5) f32."""
    B = x.shape[0]

    if B <= SMALL_B:
        # Overhead-bound regime: no grid, no pipelining, one op, direct (B, 5)
        # output.  (Plain fused XLA would be cheaper still for ~800 FLOPs,
        # but Pallas is mandated here.)
        return pl.pallas_call(
            _linear_kernel,
            out_shape=jax.ShapeDtypeStruct((B, OUT_FEATURES), x.dtype),
            in_specs=[
                pl.BlockSpec(memory_space=pltpu.MemorySpace.VMEM),
                pl.BlockSpec(memory_space=pltpu.MemorySpace.VMEM),
                pl.BlockSpec(memory_space=pltpu.MemorySpace.VMEM),
            ],
            out_specs=pl.BlockSpec(memory_space=pltpu.MemorySpace.VMEM),
        )(x, w_t, b_row)

    # Memory-bound regime: tile the batch, keep W/bias resident, write the
    # (B, 5) result directly (no padded slab, no trailing slice).
    tm = _pick_tm(B)
    return pl.pallas_call(
        _linear_kernel,
        out_shape=jax.ShapeDtypeStruct((B, OUT_FEATURES), x.dtype),
        grid=(pl.cdiv(B, tm),),
        in_specs=[
            pl.BlockSpec((tm, IN_FEATURES), lambda i: (i, 0)),
            pl.BlockSpec((IN_FEATURES, OUT_FEATURES), lambda i: (0, 0)),
            pl.BlockSpec((1, OUT_FEATURES), lambda i: (0, 0)),
        ],
        out_specs=pl.BlockSpec((tm, OUT_FEATURES), lambda i: (i, 0)),
        compiler_params=pltpu.CompilerParams(
            dimension_semantics=("parallel",)),
    )(x, w_t, b_row)


if __name__ == "__main__":
    key = jax.random.PRNGKey(0)
    k_x, k_w, k_b, k_x2 = jax.random.split(key, 4)

    # PyTorch nn.Linear default init: U(-1/sqrt(in), 1/sqrt(in)).
    bound = 1.0 / jnp.sqrt(jnp.float32(IN_FEATURES))
    weight = jax.random.uniform(
        k_w, (OUT_FEATURES, IN_FEATURES), jnp.float32, -bound, bound)
    bias = jax.random.uniform(
        k_b, (OUT_FEATURES,), jnp.float32, -bound, bound)

    # One-time prep (transpose folded out of the hot path).
    w_t, b_row = jax.block_until_ready(prepare_params(weight, bias))

    # Small-batch path (matches the module's tiny Linear usage).
    B = 8
    x = jax.random.normal(k_x, (B, IN_FEATURES), jnp.float32)
    y = jax.block_until_ready(dummy_model_forward(x, w_t, b_row))
    y_ref = x @ weight.T + bias
    assert y.shape == (B, OUT_FEATURES)
    assert jnp.allclose(y, y_ref, atol=1e-5, rtol=1e-5)

    # Exercise the tiled parallel path with a non-multiple batch size to lock
    # in partial-final-tile masking behavior (grid keeps >= 2 steps).
    B2 = 4100
    x2 = jax.random.normal(k_x2, (B2, IN_FEATURES), jnp.float32)
    y2 = jax.block_until_ready(dummy_model_forward(x2, w_t, b_row))
    assert y2.shape == (B2, OUT_FEATURES)
    assert jnp.allclose(y2, x2 @ weight.T + bias, atol=1e-4, rtol=1e-4)

    print("KERNEL_OK")
</pallas_src>

<mosaic_0001>
module attributes {stable_mosaic.version = 11 : i64} {
  func.func @_linear_kernel(%arg0: memref<8x10xf32, #tpu.memory_space<vmem>>, %arg1: memref<10x5xf32, #tpu.memory_space<vmem>>, %arg2: memref<1x5xf32, #tpu.memory_space<vmem>>, %arg3: memref<8x5xf32, #tpu.memory_space<vmem>>) attributes {dimension_semantics = [], scalar_prefetch = 0 : i64, scratch_operands = 0 : i64, tpu.core_type = #tpu.core_type<tc>} {
    %c0 = arith.constant 0 : index
    %c0_0 = arith.constant 0 : index
    %0 = vector.load %arg0[%c0, %c0_0] : memref<8x10xf32, #tpu.memory_space<vmem>>, vector<8x10xf32>
    %c0_1 = arith.constant 0 : index
    %c0_2 = arith.constant 0 : index
    %1 = vector.load %arg1[%c0_1, %c0_2] : memref<10x5xf32, #tpu.memory_space<vmem>>, vector<10x5xf32>
    %cst = arith.constant dense<0.000000e+00> : vector<8x5xf32>
    %2 = tpu.matmul %0, %1, %cst {dimension_numbers = #tpu.dot_dimension_numbers<[1], [0], [0], [1], [0, 0, 1, 1], [], []>} : vector<8x10xf32>, vector<10x5xf32>, vector<8x5xf32> -> vector<8x5xf32>
    %c0_3 = arith.constant 0 : index
    %c0_4 = arith.constant 0 : index
    %3 = vector.load %arg2[%c0_3, %c0_4] : memref<1x5xf32, #tpu.memory_space<vmem>>, vector<1x5xf32>
    %4 = vector.broadcast %3 : vector<1x5xf32> to vector<8x5xf32>
    %5 = arith.addf %2, %4 : vector<8x5xf32>
    %c0_5 = arith.constant 0 : index
    %c0_6 = arith.constant 0 : index
    %6 = vector.load %arg3[%c0_5, %c0_6] : memref<8x5xf32, #tpu.memory_space<vmem>>, vector<8x5xf32>
    tpu.vector_store %arg3[%c0_5, %c0_6], %5 {strides = array<i32>} : memref<8x5xf32, #tpu.memory_space<vmem>>, vector<8x5xf32>,
    return
  }
}

</mosaic_0001>

<bundles_post_ra>
// kernel: tpu_custom_call.1
= control target key start
LH: loop header
LB: loop body
LE: loop exit
PB: predicated region body
PF: predicated region fallthrough
CT: control target
= control target key end

     0   :  { %vm29_vm0 = vcmask 1041408   ;;  %v165_v2 = vmov 0.0|0.0   ;;  %vm166_vm1 = vmmov 1   ;;  %vm167_vm3 = vmmov 0   ;;  %s214_s0 = inlined_call_operand.vmem [shape: f32[8,10], index: 0, kind: input, shape index: {}]   ;;  %s215_s1 = inlined_call_operand.vmem [shape: f32[10,5], index: 1, kind: input, shape index: {}]   ;;  %s216_s2 = inlined_call_operand.vmem [shape: f32[1,5], index: 2, kind: input, shape index: {}]   ;;  %s217_s3 = inlined_call_operand.hbm [shape: f32[8,5], index: 3, kind: output, shape index: {}]  }
   0x1   :  { %v16_v0 = vld [vmem:[%s215_s1] sm:$0xff]  ;;  %v17_v1 = vld [vmem:[%s215_s1 + $0x8] sm:$0x3]  ;;  %132 = vmatprep.subr.bf16.mxu0 %v165_v2  ;;  %vm134_vm2 = vmpackc.low %vm29_vm0, %vm166_vm1  ;;  %v168_v4 = vmov 0.0  }
   0x2   :  { %v133_v3 = vpack.c.bf16 %v17_v1, %v16_v0  ;;  %129 = vmatprep.mubr.msk.f32.mxu0 %vm167_vm3, %v168_v4 }
   0x3   :  { %8 = vsyncpa [#allocation3], 0  ;;  %v15_v5 = vld [vmem:[%s214_s0] sm:$0xff]  ;;  %vm25_vm4 = vcmask 80896   ;;  %s169_s1 = smov [#allocation2]   ;;  %vm103_vm5 = vcmask 39936  }
   0x4   :  { %135 = vmatpush3.bf16.msk.msra.mxu0 %vm134_vm2, %v133_v3  ;;  %v119_v6 = vld [vmem:[%s216_s2] ss:$0 sm:$0xff]  ;;  %s111_s20 = sshll.u32 %s169_s1, 4  ;;  %s112_s20 = int_to_ptr.vmem [resolvable:$true] %s111_s20 }
   0x5   :  { %s141_s21 = scalar_lea.vmem %s112_s20, 128  ;;  %p146_p1 = scmp.lt.s32.totalorder %s112_s20, %s112_s20 }
   0x6   :  { %p142_p0 = scmp.ne.s32.totalorder %s112_s20, %s141_s21  ;;  %p147_p2 = scmp.lt.s32.totalorder %s141_s21, %s141_s21 }
   0x7   :  { %130 = vmatmul.mubr.msk.f32.vlgmr.msra.gmra.mrb[0].mxu0 %vm25_vm4, %v15_v5 }
   0x8   :  { %p148_p3 = por %p147_p2, %p146_p1 }
   0xa   :  { %p149_p4 = pnand %p148_p3, %p142_p0 }
  0xda   :  { %v99_v7 = vpop.f32.mrb[0].mxu0 }
  0xdb   :  { %v100_v8 = vadd.f32 %v119_v6, %v99_v7  ;;  %v131_v9 = vpop.f32.mrb[1].mxu0 }
  0xdd   :  { %104 = vst.msk [vmem:[#allocation2] sm:$0xff] %vm103_vm5, %v100_v8 }
  0xde   :  { %152 = shalt.err (!%p149_p4)
}
  0xdf   :  { %s153_s23 = scalar_lea.hbm %s217_s3, 128 }
  0xe0   :  { %p154_p5 = scmp.ne.s32.totalorder %s217_s3, %s153_s23  ;;  %p157_p6 = scmp.lt.u32.totalorder %s153_s23, %s217_s3 }
  0xe2   :  { %p159_p7 = pnand %p157_p6, %p154_p5 }
  0xe4   :  { %162 = shalt.err (!%p159_p7)
}
  0xe5   :  { %114 = dma.vmem_to_hbm [thread:$0]  %s112_s20, 128, %s217_s3, [#allocation3]  }
  0xe6   :  { %163 = dma.done.wait [#allocation3], 128  }
  0xe7   :  { %164 = vsyncadd [#allocation3], 4294967168 }
  0xe8   :  { %118 = vsyncpa [#allocation3], 1 }

</bundles_post_ra>
